<compile_context>
chip_gen: v6e
topology: v6e:2x2x1
jax: 0.10.0
libtpu: 0.0.40
codegen_flags: <defaults>
</compile_context>

<pallas_src>
import jax
import jax.numpy as jnp
from jax import lax
from jax.experimental import pallas as pl
from jax.experimental.pallas import tpu as pltpu

LANE = 128
MAX_BLOCK_ROWS = 512            # 512x128 f32 block = 256 KiB; whole kernel stays O(MiB) of VMEM


def _round_up(x, m):
    return ((x + m - 1) // m) * m


def _make_neg_errors_kernel(p_real, block_rows):
    """Elementwise stage: stores NEGATED errors, probs*(2t-1) - 1  in [-2, 0].

    Negating here lets the glue run a single ascending key/value sort (== descending on the
    true errors) with no extra elementwise HBM pass.  Padding elements (flat index >= p_real)
    are set to +1.0 so they sort strictly last; with gt = 0 and relu(err) = 0 they contribute
    nothing to the loss.
    """

    def kernel(x_ref, t_ref, out_ref):
        x = x_ref[...]                                   # (block_rows, 128) f32
        t = t_ref[...]
        neg_err = jax.nn.sigmoid(x) * (2.0 * t - 1.0) - 1.0
        i = pl.program_id(0)
        row = lax.broadcasted_iota(jnp.int32, x.shape, 0)
        lane = lax.broadcasted_iota(jnp.int32, x.shape, 1)
        k = (i * block_rows + row) * LANE + lane         # global flat index
        out_ref[...] = jnp.where(k < p_real, neg_err, 1.0)

    return kernel


def _make_lovasz_kernel(block_rows):
    """Streaming Lovasz gradient + weighted reduction over the sorted (rows, 128) blocks.

    Per sequential grid step:
      * blocked inclusive cumsum of gt: (block_rows,128)bf16 @ (128,128) upper-tri bf16 on the MXU
        for within-row cumsums, plus a tiny strictly-lower-tri matmul for the per-row carry
        (kept f32: degenerate N=1, negligible work),
      * add the running cross-block carry held in VMEM scratch,
      * jaccard / grad / relu(err)-weighted partial loss accumulated into the resident (1,1) output.
    Exactness: gt, tri entries are 0/1 (exact in bf16); all cumsums accumulate in f32, exact
    for P < 2**24 pixels (same caveat as the float32 reference).
    """

    def kernel(gts_ref, nerr_ref, gt_ref, u_ref, l_ref, out_ref, carry_ref):
        i = pl.program_id(0)

        @pl.when(i == 0)
        def _():
            out_ref[...] = jnp.zeros_like(out_ref)
            carry_ref[...] = jnp.zeros_like(carry_ref)

        gts = gts_ref[...]                               # (1, 128) total positives, replicated
        carry_in = carry_ref[...]                        # (1, 1) positives in earlier blocks
        gt = gt_ref[...]                                 # (block_rows, 128) f32 in {0, 1}

        # --- blocked inclusive cumsum of gt over the flattened block ---
        cumrow = jnp.dot(gt.astype(jnp.bfloat16), u_ref[...],
                         preferred_element_type=jnp.float32)        # within-row cumsum
        rowsum = jnp.sum(gt, axis=1, keepdims=True)                  # (block_rows, 1)
        rowcarry = jnp.dot(l_ref[...], rowsum,
                           preferred_element_type=jnp.float32)       # exclusive row carry
        c_prev = carry_in + rowcarry                                  # cumsum before each row
        cum_gt = c_prev + cumrow                                      # global inclusive cumsum

        row = lax.broadcasted_iota(jnp.int32, gt.shape, 0)
        lane = lax.broadcasted_iota(jnp.int32, gt.shape, 1)
        k = (i * block_rows + row) * LANE + lane                      # global sorted index
        kf = k.astype(jnp.float32)                                    # exact for P < 2**24

        intersection = gts - cum_gt
        union = gts + (kf + 1.0) - cum_gt                             # == gts + cumsum(1 - gt)
        # NOTE: pl.reciprocal(union, approx=True) would move this fully onto the EUP;
        # kept exact to preserve the tight validation tolerance.
        jaccard = 1.0 - intersection / union

        # jaccard at index k-1:
        #   lane >= 1 : previous lane of the same row (XLU lane roll, free slot)
        #   lane == 0 : last element of the previous row, recomputed from the row carry
        prev_lane = pltpu.roll(jaccard, shift=1, axis=1)
        prev_col0 = 1.0 - (gts - c_prev) / (gts + kf - c_prev)        # valid where lane == 0
        prev = jnp.where(lane == 0, prev_col0, prev_lane)
        prev = jnp.where(k == 0, 0.0, prev)                           # grad[0] = jaccard[0]

        relu_err = jnp.maximum(-nerr_ref[...], 0.0)                   # errors were stored negated
        out_ref[...] += jnp.sum(relu_err * (jaccard - prev))

        carry_ref[...] = carry_in + jnp.sum(rowsum)

    return kernel


def lovasz_hinge_loss(inputs, targets):
    """Forward pass of LovaszHingeLoss (per_image=False, ignore=None)."""
    p_real = inputs.size
    rows = pl.cdiv(p_real, LANE)
    if rows <= MAX_BLOCK_ROWS:
        rows_pad = _round_up(rows, 8)            # full 8-sublane vregs, single block
        block_rows = rows_pad
    else:
        rows_pad = _round_up(rows, MAX_BLOCK_ROWS)
        block_rows = MAX_BLOCK_ROWS
    p_pad = rows_pad * LANE
    n_blocks = rows_pad // block_rows

    x = jnp.ravel(inputs).astype(jnp.float32)
    t = jnp.ravel(targets).astype(jnp.float32)
    x2 = jnp.pad(x, (0, p_pad - p_real)).reshape(rows_pad, LANE)
    t2 = jnp.pad(t, (0, p_pad - p_real)).reshape(rows_pad, LANE)

    neg_err = pl.pallas_call(
        _make_neg_errors_kernel(p_real, block_rows),
        out_shape=jax.ShapeDtypeStruct((rows_pad, LANE), jnp.float32),
        grid=(n_blocks,),
        in_specs=[pl.BlockSpec((block_rows, LANE), lambda i: (i, 0)),
                  pl.BlockSpec((block_rows, LANE), lambda i: (i, 0))],
        out_specs=pl.BlockSpec((block_rows, LANE), lambda i: (i, 0)),
        compiler_params=pltpu.CompilerParams(
            dimension_semantics=("parallel",)),
    )(x2, t2)

    # Fused key/value sort: one pass permutes the labels alongside the keys (no argsort + gathers).
    # TODO(synk): descending sort has no Pallas TPU primitive; this stays in JAX glue.
    neg_sorted, gt_sorted = lax.sort_key_val(neg_err.reshape(-1), t2.reshape(-1))
    neg_sorted = neg_sorted.reshape(rows_pad, LANE)
    gt_sorted = gt_sorted.reshape(rows_pad, LANE)

    gts = jnp.full((1, LANE), jnp.sum(t2), dtype=jnp.float32)   # total positives (pads are 0)
    u_lane = jnp.triu(jnp.ones((LANE, LANE), jnp.float32)).astype(jnp.bfloat16)
    l_rows = jnp.tril(jnp.ones((block_rows, block_rows), jnp.float32), k=-1)

    loss = pl.pallas_call(
        _make_lovasz_kernel(block_rows),
        out_shape=jax.ShapeDtypeStruct((1, 1), jnp.float32),
        grid=(n_blocks,),
        in_specs=[pl.BlockSpec((1, LANE), lambda i: (0, 0)),                      # gts
                  pl.BlockSpec((block_rows, LANE), lambda i: (i, 0)),             # sorted -errors
                  pl.BlockSpec((block_rows, LANE), lambda i: (i, 0)),             # sorted labels
                  pl.BlockSpec((LANE, LANE), lambda i: (0, 0)),                   # 128x128 upper tri (resident)
                  pl.BlockSpec((block_rows, block_rows), lambda i: (0, 0))],      # strict lower tri (resident)
        out_specs=pl.BlockSpec((1, 1), lambda i: (0, 0)),                         # resident accumulator
        scratch_shapes=[pltpu.VMEM((1, 1), jnp.float32)],                         # running cumsum carry
        compiler_params=pltpu.CompilerParams(
            dimension_semantics=("arbitrary",),          # sequential: carries cross-block state
            vmem_limit_bytes=32 * 1024 * 1024),          # explicit budget; ~3 MiB resident << v7x 64 MiB
    )(gts, neg_sorted, gt_sorted, u_lane, l_rows)
    return loss[0, 0]


def _reference(inputs, targets):
    """Pure-JAX reproduction of the PyTorch module's forward for validation."""
    x = jnp.ravel(inputs).astype(jnp.float32)
    t = jnp.ravel(targets).astype(jnp.float32)
    probs = jax.nn.sigmoid(x)
    signs = 2.0 * t - 1.0
    errors = 1.0 - probs * signs
    order = jnp.argsort(-errors)
    err_s = errors[order]
    gt_s = t[order]
    gts = gt_s.sum()
    inter = gts - jnp.cumsum(gt_s)
    union = gts + jnp.cumsum(1.0 - gt_s)
    jac = 1.0 - inter / union
    jac = jnp.concatenate([jac[:1], jac[1:] - jac[:-1]])
    return jnp.dot(jnp.maximum(err_s, 0.0), jac)


if __name__ == "__main__":
    B, H, W = 2, 16, 16
    key = jax.random.PRNGKey(0)
    k1, k2 = jax.random.split(key)
    inputs = jax.random.normal(k1, (B, H, W), dtype=jnp.float32)               # raw logits
    targets = (jax.random.uniform(k2, (B, H, W)) > 0.5).astype(jnp.float32)    # binary masks

    loss_fn = jax.jit(lovasz_hinge_loss)
    loss = jax.block_until_ready(loss_fn(inputs, targets))

    ref = jax.block_until_ready(_reference(inputs, targets))
    assert jnp.allclose(loss, ref, rtol=1e-4, atol=1e-5), (loss, ref)

    print("KERNEL_OK")
</pallas_src>

<mosaic_0001>
module attributes {stable_mosaic.version = 11 : i64} {
  func.func @kernel(%arg0: i32, %arg1: memref<1x128xf32, #tpu.memory_space<vmem>>, %arg2: memref<8x128xf32, #tpu.memory_space<vmem>>, %arg3: memref<8x128xf32, #tpu.memory_space<vmem>>, %arg4: memref<128x128xbf16, #tpu.memory_space<vmem>>, %arg5: memref<8x8xf32, #tpu.memory_space<vmem>>, %arg6: memref<1x1xf32, #tpu.memory_space<vmem>>, %arg7: memref<1x1xf32, #tpu.memory_space<vmem>>) attributes {dimension_semantics = [#tpu.dimension_semantics<arbitrary>], iteration_bounds = array<i64: 1>, scalar_prefetch = 0 : i64, scratch_operands = 1 : i64, tpu.core_type = #tpu.core_type<tc>, window_params = [{pipeline_mode = #tpu.pipeline_mode<synchronous>, transform_indices = @transform_0, window_bounds = array<i64: 1, 128>}, {transform_indices = @transform_1, window_bounds = array<i64: 8, 128>}, {transform_indices = @transform_2, window_bounds = array<i64: 8, 128>}, {pipeline_mode = #tpu.pipeline_mode<synchronous>, transform_indices = @transform_3, window_bounds = array<i64: 128, 128>}, {pipeline_mode = #tpu.pipeline_mode<synchronous>, transform_indices = @transform_4, window_bounds = array<i64: 8, 8>}, {pipeline_mode = #tpu.pipeline_mode<synchronous>, transform_indices = @transform_5, window_bounds = array<i64: 1, 1>}]} {
    %c0_i32 = arith.constant 0 : i32
    %0 = arith.cmpi eq, %arg0, %c0_i32 : i32
    %1 = arith.extui %0 : i1 to i32
    %c0_i32_0 = arith.constant 0 : i32
    %2 = arith.cmpi ne, %1, %c0_i32_0 : i32
    scf.if %2 {
      %cst_30 = arith.constant 0.000000e+00 : f32
      %76 = vector.broadcast %cst_30 : f32 to vector<1x1xf32>
      %c0_31 = arith.constant 0 : index
      %c0_32 = arith.constant 0 : index
      %77 = vector.load %arg6[%c0_31, %c0_32] : memref<1x1xf32, #tpu.memory_space<vmem>>, vector<1x1xf32>
      tpu.vector_store %arg6[%c0_31, %c0_32], %76 {strides = array<i32>} : memref<1x1xf32, #tpu.memory_space<vmem>>, vector<1x1xf32>,
      %cst_33 = arith.constant 0.000000e+00 : f32
      %78 = vector.broadcast %cst_33 : f32 to vector<1x1xf32>
      %c0_34 = arith.constant 0 : index
      %c0_35 = arith.constant 0 : index
      %79 = vector.load %arg7[%c0_34, %c0_35] : memref<1x1xf32, #tpu.memory_space<vmem>>, vector<1x1xf32>
      tpu.vector_store %arg7[%c0_34, %c0_35], %78 {strides = array<i32>} : memref<1x1xf32, #tpu.memory_space<vmem>>, vector<1x1xf32>,
    } else {
    }
    %c0 = arith.constant 0 : index
    %c0_1 = arith.constant 0 : index
    %3 = vector.load %arg1[%c0, %c0_1] : memref<1x128xf32, #tpu.memory_space<vmem>>, vector<1x128xf32>
    %c0_2 = arith.constant 0 : index
    %c0_3 = arith.constant 0 : index
    %4 = vector.load %arg7[%c0_2, %c0_3] : memref<1x1xf32, #tpu.memory_space<vmem>>, vector<1x1xf32>
    %c0_4 = arith.constant 0 : index
    %c0_5 = arith.constant 0 : index
    %5 = vector.load %arg3[%c0_4, %c0_5] : memref<8x128xf32, #tpu.memory_space<vmem>>, vector<8x128xf32>
    %6 = arith.truncf %5 : vector<8x128xf32> to vector<8x128xbf16>
    %c0_6 = arith.constant 0 : index
    %c0_7 = arith.constant 0 : index
    %7 = vector.load %arg4[%c0_6, %c0_7] : memref<128x128xbf16, #tpu.memory_space<vmem>>, vector<128x128xbf16>
    %cst = arith.constant dense<0.000000e+00> : vector<8x128xf32>
    %8 = tpu.matmul %6, %7, %cst {dimension_numbers = #tpu.dot_dimension_numbers<[1], [0], [0], [1], [0, 0, 1, 1], [], []>} : vector<8x128xbf16>, vector<128x128xbf16>, vector<8x128xf32> -> vector<8x128xf32>
    %cst_8 = arith.constant dense<0.000000e+00> : vector<8xf32>
    %9 = vector.multi_reduction <add>, %5, %cst_8 [1] : vector<8x128xf32> to vector<8xf32>
    %10 = vector.shape_cast %9 : vector<8xf32> to vector<8x1xf32>
    %c0_9 = arith.constant 0 : index
    %c0_10 = arith.constant 0 : index
    %11 = vector.load %arg5[%c0_9, %c0_10] : memref<8x8xf32, #tpu.memory_space<vmem>>, vector<8x8xf32>
    %cst_11 = arith.constant dense<0.000000e+00> : vector<8x1xf32>
    %12 = tpu.matmul %11, %10, %cst_11 {dimension_numbers = #tpu.dot_dimension_numbers<[1], [0], [0], [1], [0, 0, 1, 1], [], []>} : vector<8x8xf32>, vector<8x1xf32>, vector<8x1xf32> -> vector<8x1xf32>
    %13 = vector.broadcast %4 : vector<1x1xf32> to vector<8x1xf32>
    %14 = arith.addf %13, %12 : vector<8x1xf32>
    %15 = vector.broadcast %14 : vector<8x1xf32> to vector<8x128xf32>
    %16 = arith.addf %15, %8 : vector<8x128xf32>
    %17 = tpu.iota {dimensions = array<i32: 0>} : vector<8x128xi32>
    %18 = tpu.iota {dimensions = array<i32: 1>} : vector<8x128xi32>
    %c8_i32 = arith.constant 8 : i32
    %19 = arith.muli %arg0, %c8_i32 : i32
    %20 = vector.broadcast %19 : i32 to vector<8x128xi32>
    %21 = arith.addi %20, %17 : vector<8x128xi32>
    %c128_i32 = arith.constant 128 : i32
    %22 = vector.broadcast %c128_i32 : i32 to vector<8x128xi32>
    %23 = arith.muli %21, %22 : vector<8x128xi32>
    %24 = arith.addi %23, %18 : vector<8x128xi32>
    %25 = arith.sitofp %24 : vector<8x128xi32> to vector<8x128xf32>
    %26 = vector.broadcast %3 : vector<1x128xf32> to vector<8x128xf32>
    %27 = arith.subf %26, %16 : vector<8x128xf32>
    %cst_12 = arith.constant 1.000000e+00 : f32
    %28 = vector.broadcast %cst_12 : f32 to vector<8x128xf32>
    %29 = arith.addf %25, %28 : vector<8x128xf32>
    %30 = vector.broadcast %3 : vector<1x128xf32> to vector<8x128xf32>
    %31 = arith.addf %30, %29 : vector<8x128xf32>
    %32 = arith.subf %31, %16 : vector<8x128xf32>
    %33 = arith.divf %27, %32 : vector<8x128xf32>
    %cst_13 = arith.constant 1.000000e+00 : f32
    %34 = vector.broadcast %cst_13 : f32 to vector<8x128xf32>
    %35 = arith.subf %34, %33 : vector<8x128xf32>
    %c1_i32 = arith.constant 1 : i32
    %36 = tpu.dynamic_rotate %35 by %c1_i32 dim 1 : vector<8x128xf32>, i32 -> vector<8x128xf32>
    %37 = vector.broadcast %3 : vector<1x128xf32> to vector<8x128xf32>
    %38 = vector.broadcast %14 : vector<8x1xf32> to vector<8x128xf32>
    %39 = arith.subf %37, %38 : vector<8x128xf32>
    %40 = vector.broadcast %3 : vector<1x128xf32> to vector<8x128xf32>
    %41 = arith.addf %40, %25 : vector<8x128xf32>
    %42 = vector.broadcast %14 : vector<8x1xf32> to vector<8x128xf32>
    %43 = arith.subf %41, %42 : vector<8x128xf32>
    %44 = arith.divf %39, %43 : vector<8x128xf32>
    %cst_14 = arith.constant 1.000000e+00 : f32
    %45 = vector.broadcast %cst_14 : f32 to vector<8x128xf32>
    %46 = arith.subf %45, %44 : vector<8x128xf32>
    %c0_i32_15 = arith.constant 0 : i32
    %47 = vector.broadcast %c0_i32_15 : i32 to vector<8x128xi32>
    %48 = arith.cmpi eq, %18, %47 : vector<8x128xi32>
    %49 = arith.select %48, %46, %36 : vector<8x128xi1>, vector<8x128xf32>
    %c0_i32_16 = arith.constant 0 : i32
    %50 = vector.broadcast %c0_i32_16 : i32 to vector<8x128xi32>
    %51 = arith.cmpi eq, %24, %50 : vector<8x128xi32>
    %cst_17 = arith.constant 0.000000e+00 : f32
    %52 = vector.broadcast %cst_17 : f32 to vector<8x128xf32>
    %53 = arith.select %51, %52, %49 : vector<8x128xi1>, vector<8x128xf32>
    %c0_18 = arith.constant 0 : index
    %c0_19 = arith.constant 0 : index
    %54 = vector.load %arg2[%c0_18, %c0_19] : memref<8x128xf32, #tpu.memory_space<vmem>>, vector<8x128xf32>
    %cst_20 = arith.constant 0.000000e+00 : f32
    %55 = vector.broadcast %cst_20 : f32 to vector<8x128xf32>
    %56 = arith.subf %55, %54 : vector<8x128xf32>
    %cst_21 = arith.constant 0.000000e+00 : f32
    %57 = vector.broadcast %cst_21 : f32 to vector<8x128xf32>
    %58 = arith.maximumf %56, %57 : vector<8x128xf32>
    %c0_22 = arith.constant 0 : index
    %c0_23 = arith.constant 0 : index
    %59 = vector.load %arg6[%c0_22, %c0_23] : memref<1x1xf32, #tpu.memory_space<vmem>>, vector<1x1xf32>
    %60 = arith.subf %35, %53 : vector<8x128xf32>
    %61 = arith.mulf %58, %60 : vector<8x128xf32>
    %62 = vector.shape_cast %61 : vector<8x128xf32> to vector<1x8x128xf32>
    %cst_24 = arith.constant dense<0.000000e+00> : vector<1xf32>
    %63 = vector.multi_reduction <add>, %62, %cst_24 [1, 2] : vector<1x8x128xf32> to vector<1xf32>
    %64 = vector.shape_cast %63 : vector<1xf32> to vector<1x1x1xf32>
    %65 = vector.extract %64[0, 0, 0] : f32 from vector<1x1x1xf32>
    %66 = vector.broadcast %65 : f32 to vector<1x1xf32>
    %67 = arith.addf %59, %66 : vector<1x1xf32>
    %c0_25 = arith.constant 0 : index
    %c0_26 = arith.constant 0 : index
    %68 = vector.load %arg6[%c0_25, %c0_26] : memref<1x1xf32, #tpu.memory_space<vmem>>, vector<1x1xf32>
    tpu.vector_store %arg6[%c0_25, %c0_26], %67 {strides = array<i32>} : memref<1x1xf32, #tpu.memory_space<vmem>>, vector<1x1xf32>,
    %69 = vector.shape_cast %10 : vector<8x1xf32> to vector<1x8x1xf32>
    %cst_27 = arith.constant dense<0.000000e+00> : vector<1xf32>
    %70 = vector.multi_reduction <add>, %69, %cst_27 [1, 2] : vector<1x8x1xf32> to vector<1xf32>
    %71 = vector.shape_cast %70 : vector<1xf32> to vector<1x1x1xf32>
    %72 = vector.extract %71[0, 0, 0] : f32 from vector<1x1x1xf32>
    %73 = vector.broadcast %72 : f32 to vector<1x1xf32>
    %74 = arith.addf %4, %73 : vector<1x1xf32>
    %c0_28 = arith.constant 0 : index
    %c0_29 = arith.constant 0 : index
    %75 = vector.load %arg7[%c0_28, %c0_29] : memref<1x1xf32, #tpu.memory_space<vmem>>, vector<1x1xf32>
    tpu.vector_store %arg7[%c0_28, %c0_29], %74 {strides = array<i32>} : memref<1x1xf32, #tpu.memory_space<vmem>>, vector<1x1xf32>,
    return
  }
  func.func @transform_0(%arg0: i32) -> (i32, i32) {
    %c0_i32 = arith.constant 0 : i32
    %c0_i32_0 = arith.constant 0 : i32
    %c0_i32_1 = arith.constant 0 : i32
    return %c0_i32, %c0_i32_0 : i32, i32
  }
  func.func @transform_1(%arg0: i32) -> (i32, i32) {
    %c0_i32 = arith.constant 0 : i32
    %c0_i32_0 = arith.constant 0 : i32
    return %arg0, %c0_i32 : i32, i32
  }
  func.func @transform_2(%arg0: i32) -> (i32, i32) {
    %c0_i32 = arith.constant 0 : i32
    %c0_i32_0 = arith.constant 0 : i32
    return %arg0, %c0_i32 : i32, i32
  }
  func.func @transform_3(%arg0: i32) -> (i32, i32) {
    %c0_i32 = arith.constant 0 : i32
    %c0_i32_0 = arith.constant 0 : i32
    %c0_i32_1 = arith.constant 0 : i32
    return %c0_i32, %c0_i32_0 : i32, i32
  }
  func.func @transform_4(%arg0: i32) -> (i32, i32) {
    %c0_i32 = arith.constant 0 : i32
    %c0_i32_0 = arith.constant 0 : i32
    %c0_i32_1 = arith.constant 0 : i32
    return %c0_i32, %c0_i32_0 : i32, i32
  }
  func.func @transform_5(%arg0: i32) -> (i32, i32) {
    %c0_i32 = arith.constant 0 : i32
    %c0_i32_0 = arith.constant 0 : i32
    %c0_i32_1 = arith.constant 0 : i32
    return %c0_i32, %c0_i32_0 : i32, i32
  }
}

module attributes {stable_mosaic.version = 11 : i64} {
  func.func @kernel(%arg0: i32, %arg1: memref<8x128xf32, #tpu.memory_space<vmem>>, %arg2: memref<8x128xf32, #tpu.memory_space<vmem>>, %arg3: memref<8x128xf32, #tpu.memory_space<vmem>>) attributes {dimension_semantics = [#tpu.dimension_semantics<parallel>], iteration_bounds = array<i64: 1>, scalar_prefetch = 0 : i64, scratch_operands = 0 : i64, tpu.core_type = #tpu.core_type<tc>, window_params = [{transform_indices = @transform_0, window_bounds = array<i64: 8, 128>}, {transform_indices = @transform_1, window_bounds = array<i64: 8, 128>}, {transform_indices = @transform_2, window_bounds = array<i64: 8, 128>}]} {
    %c0 = arith.constant 0 : index
    %c0_0 = arith.constant 0 : index
    %0 = vector.load %arg1[%c0, %c0_0] : memref<8x128xf32, #tpu.memory_space<vmem>>, vector<8x128xf32>
    %c0_1 = arith.constant 0 : index
    %c0_2 = arith.constant 0 : index
    %1 = vector.load %arg2[%c0_1, %c0_2] : memref<8x128xf32, #tpu.memory_space<vmem>>, vector<8x128xf32>
    %2 = arith.negf %0 : vector<8x128xf32>
    %3 = math.exp %2 : vector<8x128xf32>
    %cst = arith.constant 1.000000e+00 : f32
    %4 = vector.broadcast %cst : f32 to vector<8x128xf32>
    %5 = arith.addf %4, %3 : vector<8x128xf32>
    %6 = arith.divf %4, %5 : vector<8x128xf32>
    %cst_3 = arith.constant 2.000000e+00 : f32
    %7 = vector.broadcast %cst_3 : f32 to vector<8x128xf32>
    %8 = arith.mulf %7, %1 : vector<8x128xf32>
    %cst_4 = arith.constant 1.000000e+00 : f32
    %9 = vector.broadcast %cst_4 : f32 to vector<8x128xf32>
    %10 = arith.subf %8, %9 : vector<8x128xf32>
    %11 = arith.mulf %6, %10 : vector<8x128xf32>
    %cst_5 = arith.constant 1.000000e+00 : f32
    %12 = vector.broadcast %cst_5 : f32 to vector<8x128xf32>
    %13 = arith.subf %11, %12 : vector<8x128xf32>
    %14 = tpu.iota {dimensions = array<i32: 0>} : vector<8x128xi32>
    %15 = tpu.iota {dimensions = array<i32: 1>} : vector<8x128xi32>
    %c8_i32 = arith.constant 8 : i32
    %16 = arith.muli %arg0, %c8_i32 : i32
    %17 = vector.broadcast %16 : i32 to vector<8x128xi32>
    %18 = arith.addi %17, %14 : vector<8x128xi32>
    %c128_i32 = arith.constant 128 : i32
    %19 = vector.broadcast %c128_i32 : i32 to vector<8x128xi32>
    %20 = arith.muli %18, %19 : vector<8x128xi32>
    %21 = arith.addi %20, %15 : vector<8x128xi32>
    %c512_i32 = arith.constant 512 : i32
    %22 = vector.broadcast %c512_i32 : i32 to vector<8x128xi32>
    %23 = arith.cmpi slt, %21, %22 : vector<8x128xi32>
    %cst_6 = arith.constant 1.000000e+00 : f32
    %24 = vector.broadcast %cst_6 : f32 to vector<8x128xf32>
    %25 = arith.select %23, %13, %24 : vector<8x128xi1>, vector<8x128xf32>
    %c0_7 = arith.constant 0 : index
    %c0_8 = arith.constant 0 : index
    %26 = vector.load %arg3[%c0_7, %c0_8] : memref<8x128xf32, #tpu.memory_space<vmem>>, vector<8x128xf32>
    tpu.vector_store %arg3[%c0_7, %c0_8], %25 {strides = array<i32>} : memref<8x128xf32, #tpu.memory_space<vmem>>, vector<8x128xf32>,
    return
  }
  func.func @transform_0(%arg0: i32) -> (i32, i32) {
    %c0_i32 = arith.constant 0 : i32
    %c0_i32_0 = arith.constant 0 : i32
    return %arg0, %c0_i32 : i32, i32
  }
  func.func @transform_1(%arg0: i32) -> (i32, i32) {
    %c0_i32 = arith.constant 0 : i32
    %c0_i32_0 = arith.constant 0 : i32
    return %arg0, %c0_i32 : i32, i32
  }
  func.func @transform_2(%arg0: i32) -> (i32, i32) {
    %c0_i32 = arith.constant 0 : i32
    %c0_i32_0 = arith.constant 0 : i32
    return %arg0, %c0_i32 : i32, i32
  }
}

</mosaic_0001>

<bundles_post_ra>
// kernel: lovasz_hinge_loss.2
= control target key start
LH: loop header
LB: loop body
LE: loop exit
PB: predicated region body
PF: predicated region fallthrough
CT: control target
= control target key end

     0   :  { %v23_v4 = vlaneseq  ;;  %s70_s0 = inlined_call_operand.vmem [shape: f32[8,128], index: 0, kind: input, shape index: {}]   ;;  %s71_s1 = inlined_call_operand.vmem [shape: f32[8,128], index: 1, kind: input, shape index: {}]   ;;  %s72_s2 = inlined_call_operand.vmem [shape: f32[8,128], index: 2, kind: output, shape index: {}]  }
   0x1   :  { %v11_v0 = vld [vmem:[%s70_s0] sm:$0xff] }
   0x2   :  { %v39_v1 = vmul.f32 -1.442695, %v11_v0  ;;  %v12_v5 = vld [vmem:[%s71_s1] sm:$0xff]  ;;  %v24_v6 = vshrl.u32 %v23_v4, 7  ;;  %v26_v8 = vand.u32 127, %v23_v4 }
   0x3   :  { %v19_v7 = vmul.f32 2.0, %v12_v5 }
   0x4   :  { %42 = vpow2.f32 %v39_v1  ;;  %v30_v9 = vmul.u32 128, %v24_v6 }
   0x5   :  { %v40_v10 = vadd.f32 -1.0, %v19_v7 }
   0x6   :  { %v31_v11 = vadd.s32 %v30_v9, %v26_v8 }
   0x8   :  { %vm32_vm0 = vcmp.lt.s32.totalorder %v31_v11, 512 }
  0x11   :  { %v43_v2 = vpop.eup %42 }
  0x12   :  { %v16_v3 = vadd.f32 1.0, %v43_v2 }
  0x14   :  { %44 = vrcp.f32 %v16_v3 }
  0x21   :  { %v45_v12 = vpop.eup %44 }
  0x22   :  { %v21_v13 = vmul.f32 %v45_v12, %v40_v10 }
  0x24   :  { %v41_v14 = vadd.f32 -1.0, %v21_v13 }
  0x26   :  { %v33_v15 = vsel %vm32_vm0, %v41_v14, 1.0 }
  0x27   :  { %34 = vst [vmem:[%s72_s2] sm:$0xff] %v33_v15 }

// kernel: lovasz_hinge_loss.3
= control target key start
LH: loop header
LB: loop body
LE: loop exit
PB: predicated region body
PF: predicated region fallthrough
CT: control target
= control target key end

     0   :  { %s481_s0 = inlined_call_operand.vmem [shape: f32[1,128], index: 0, kind: input, shape index: {}]   ;;  %s482_s1 = inlined_call_operand.vmem [shape: f32[8,128], index: 1, kind: input, shape index: {}]   ;;  %s483_s2 = inlined_call_operand.vmem [shape: f32[8,128], index: 2, kind: input, shape index: {}]   ;;  %s484_s3 = inlined_call_operand.vmem [shape: bf16[128,128], index: 3, kind: input, shape index: {}]   ;;  %s485_s4 = inlined_call_operand.vmem [shape: f32[8,8], index: 4, kind: input, shape index: {}]   ;;  %s486_s5 = inlined_call_operand.hbm [shape: f32[1,1], index: 5, kind: output, shape index: {}]  }
   0x1   :  { %v31_v0 = vld [vmem:[%s483_s2] sm:$0xff] }
   0x2   :  { %137 = vadd.xlane.f32.xlu0 %v31_v0 }
   0x3   :  { %10 = vsyncpa [#allocation4], 0  ;;  %v399_v1 = vmov 0.0   ;;  %vm400_vm0 = vmmov 0   ;;  %v365_v2 = vld [vmem:[%s484_s3 + $0x38] sm:$0xff]   ;;  %vm26_vm1 = vcmask 0   ;;  %v32_v10 = vpack.c.bf16 %v31_v0, %v31_v0 }
   0x4   :  { %350 = vmatprep.subr.mxu1 %v399_v1  ;;  %330 = vmatprep.subr.bf16.mxu0 %v399_v1  ;;  %28 = vst.msk [vmem:[#allocation2] sm:$0x1] %vm26_vm1, %v399_v1  ;;  %27 = vst.msk [vmem:[#allocation3] sm:$0x1] %vm26_vm1, %v399_v1  ;;  %v366_v3 = vld [vmem:[%s484_s3 + $0x30] sm:$0xff]   ;;  %v367_v4 = vld [vmem:[%s484_s3 + $0x28] sm:$0xff]   ;;  %v215_v18 = vlaneseq }
   0x5   :  { %352 = vmatprep.mubr.msk.f32.mxu1 %vm400_vm0, %v399_v1  ;;  %346 = vmatprep.mubr.msk.bf16.mxu0 %vm400_vm0, %v399_v1  ;;  %v368_v5 = vld [vmem:[%s484_s3 + $0x20] sm:$0xff]   ;;  %v369_v6 = vld [vmem:[%s484_s3 + $0x18] sm:$0xff]   ;;  %v370_v7 = vld [vmem:[%s484_s3 + $0x10] sm:$0xff]   ;;  %vm140_vm2 = vcmask 64512   ;;  %v401_v13 = vmov 0   ;;  %s402_s12 = smov 1  }
   0x6   :  { %331 = vmatpush3.bf16.msra.mxu0 %v365_v2  ;;  %v371_v8 = vld [vmem:[%s484_s3 + $0x8] sm:$0xff]   ;;  %v372_v9 = vld [vmem:[%s484_s3] sm:$0xff]   ;;  %364 = vset.pattern.permute.xlu0 %v401_v13  ;;  %v216_v19 = vshrl.u32 %v215_v18, 7  ;;  %v230_v27 = vand.u32 127, %v215_v18  ;;  %vm281_vm5 = vcmask 7168  }
   0x7   :  { %332 = vmatprep.subr.bf16.mxu0 %v399_v1  ;;  %v139_v11 = vld [vmem:[%s485_s4] sm:$0xff] }
   0x8   :  { %v217_v20 = vsub.s32 0, %v216_v19  ;;  %v234_v26 = vmul.u32 128, %v216_v19  ;;  %v318_v30 = vld [vmem:[%s481_s0] ss:$0 sm:$0xff]  ;;  %vm258_vm3 = vcmp.eq.s32.totalorder %v230_v27, 0 }
   0x9   :  { %v262_v45 = vld [vmem:[%s482_s1] sm:$0xff]  ;;  %s403_s1 = smov [#allocation3]  }
   0xa   :  { %333 = vmatpush3.bf16.msra.mxu0 %v366_v3  ;;  %v235_v28 = vadd.s32 %v234_v26, %v230_v27  ;;  %v263_v46 = vsub.f32 0.0, %v262_v45  ;;  %s301_s14 = sshll.u32 %s403_s1, 4  ;;  %s302_s14 = int_to_ptr.vmem [resolvable:$true] %s301_s14 }
   0xb   :  { %334 = vmatprep.subr.bf16.mxu0 %v399_v1  ;;  %v466_v21 = vld [vmem:[#allocation2] sm:$0x1]  ;;  %s377_s17 = scalar_lea.vmem %s302_s14, 16  ;;  %s381_s18 = scalar_lea.vmem %s302_s14, 32 }
   0xc   :  { %v218_v22 = vrot.slane %v466_v21, %v217_v20  ;;  %v236_v29 = vcvt.s32.f32 %v235_v28  ;;  %vm260_vm4 = vcmp.eq.s32.totalorder %v235_v28, 0  ;;  %v264_v50 = vmax.f32 %v263_v46, 0.0  ;;  %p378_p0 = scmp.ne.s32.totalorder %s302_s14, %s377_s17  ;;  %p382_p1 = scmp.lt.s32.totalorder %s302_s14, %s302_s14 }
   0xd   :  { %p383_p2 = scmp.lt.s32.totalorder %s381_s18, %s377_s17 }
   0xe   :  { %335 = vmatpush3.bf16.msra.mxu0 %v367_v4  ;;  %v244_v31 = vadd.f32 1.0, %v236_v29  ;;  %v253_v32 = vadd.f32 %v318_v30, %v236_v29 }
   0xf   :  { %336 = vmatprep.subr.bf16.mxu0 %v399_v1  ;;  %p384_p3 = por %p383_p2, %p382_p1 }
  0x10   :  { %v245_v33 = vadd.f32 %v318_v30, %v244_v31 }
  0x11   :  { %p385_p4 = pnand %p384_p3, %p378_p0 }
  0x12   :  { %337 = vmatpush3.bf16.msra.mxu0 %v368_v5  ;;  %v265_v5 = vld [vmem:[#allocation3] sm:$0x1] }
  0x13   :  { %338 = vmatprep.subr.bf16.mxu0 %v399_v1 }
  0x16   :  { %339 = vmatpush3.bf16.msra.mxu0 %v369_v6 }
  0x17   :  { %340 = vmatprep.subr.bf16.mxu0 %v399_v1 }
  0x1a   :  { %341 = vmatpush3.bf16.msra.mxu0 %v370_v7 }
  0x1b   :  { %342 = vmatprep.subr.bf16.mxu0 %v399_v1 }
  0x1e   :  { %343 = vmatpush3.bf16.msra.mxu0 %v371_v8 }
  0x1f   :  { %344 = vmatprep.subr.bf16.mxu0 %v399_v1 }
  0x22   :  { %345 = vmatpush3.bf16.msra.mxu0 %v372_v9 }
  0x25   :  { %347 = vmatmul.mubr.bf16.vlgmr.msra.gmra.mxu0 %v32_v10 }
  0x8b   :  { %v138_v12 = vpop.xlane.xlu0 %137 }
  0x8c   :  { %351 = vmatpush3.msra.mxu1 %v138_v12  ;;  %v282_v54 = vsel %vm281_vm5, %v138_v12, 0.0 }
  0x8d   :  { %353 = vmatmul.mubr.msk.f32.vlgmr.msra.gmra.mxu1 %vm140_vm2, %v139_v11 }
  0xe5   :  { %v131_v14 = vpop.f32.mrf.mxu0 }
  0xe7   :  { %v348_v15 = vpop.f32.mrf.mxu0 }
  0xe9   :  { %v134_v16 = vpop.f32.mrf.mxu0 }
  0xeb   :  { %v349_v17 = vpop.f32.mrf.mxu0 }
 0x14d   :  { %v210_v23 = vpop.f32.mrf.mxu1 }
 0x14e   :  { %v220_v24 = vadd.f32 %v218_v22, %v210_v23 }
 0x14f   :  { %v354_v25 = vpop.f32.mrf.mxu1 }
 0x150   :  { %223 = vperm.xlu0 %364, %v220_v24  }
 0x1cb   :  { %v224_v34 = vpop.permute.xlu0 %223 }
 0x1cc   :  { %v226_v35 = vadd.f32 %v224_v34, %v131_v14  ;;  %v254_v36 = vsub.f32 %v253_v32, %v224_v34  ;;  %v252_v38 = vsub.f32 %v318_v30, %v224_v34 }
 0x1ce   :  { %v246_v37 = vsub.f32 %v245_v33, %v226_v35  ;;  %373 = vrcp.f32 %v254_v36  ;;  %v243_v40 = vsub.f32 %v318_v30, %v226_v35 }
 0x1d0   :  { %375 = vrcp.f32 %v246_v37 }
 0x1db   :  { %v374_v39 = vpop.eup %373 }
 0x1dc   :  { %v256_v41 = vmul.f32 %v374_v39, %v252_v38 }
 0x1dd   :  { %v376_v42 = vpop.eup %375 }
 0x1de   :  { %v248_v43 = vmul.f32 %v376_v42, %v243_v40  ;;  %v257_v47 = vsub.f32 1.0, %v256_v41 }
 0x1e0   :  { %v249_v44 = vsub.f32 1.0, %v248_v43 }
 0x1e2   :  { %250 = vrot.lane.b32.xlu1 %v249_v44, %s402_s12 }
 0x254   :  { %v251_v48 = vpop.permute.xlu1 %250 }
 0x255   :  { %v259_v49 = vsel %vm258_vm3, %v257_v47, %v251_v48 }
 0x256   :  { %v261_v51 = vsel %vm260_vm4, 0.0, %v259_v49 }
 0x257   :  { %v266_v52 = vsub.f32 %v249_v44, %v261_v51 }
 0x259   :  { %v267_v53 = vmul.f32 %v266_v52, %v264_v50 }
 0x25b   :  { %268 = vadd.xlane.f32.xlu1 %v267_v53 }
 0x25f   :  { %283 = vadd.xlane.f32.xlu1 %v282_v54 }
 0x2e4   :  { %v269_v55 = vpop.xlane.xlu1 %268 }
 0x2e5   :  { %v270_v56 = vrot.slane %v269_v55, 4 }
 0x2e7   :  { %v271_v57 = vadd.f32 %v270_v56, %v269_v55 }
 0x2e8   :  { %v284_v58 = vpop.xlane.xlu1 %283 }
 0x2e9   :  { %v272_v59 = vrot.slane %v271_v57, 2  ;;  %v285_v60 = vrot.slane %v284_v58, 4 }
 0x2eb   :  { %v286_v61 = vadd.f32 %v285_v60, %v284_v58  ;;  %v273_v62 = vadd.f32 %v272_v59, %v271_v57 }
 0x2ed   :  { %v287_v63 = vrot.slane %v286_v61, 2  ;;  %v274_v0 = vrot.slane %v273_v62, 1 }
 0x2ef   :  { %v288_v1 = vadd.f32 %v287_v63, %v286_v61  ;;  %v275_v2 = vadd.f32 %v274_v0, %v273_v62 }
 0x2f1   :  { %355 = vpush %v275_v2  ;;  %v289_v3 = vrot.slane %v288_v1, 1 }
 0x2f3   :  { %v290_v4 = vadd.f32 %v289_v3, %v288_v1 }
 0x2f5   :  { %357 = vpush %v290_v4 }
 0x322   :  { %s356_s15 = spop %355 }
 0x323   :  { %v277_v6 = vstv %s356_s15 }
 0x324   :  { %v278_v7 = vadd.f32 %v277_v6, %v265_v5 }
 0x326   :  { %280 = vst.msk [vmem:[#allocation3] sm:$0x1] %vm26_vm1, %v278_v7  ;;  %s358_s16 = spop %357 }
 0x327   :  { %v292_v8 = vstv %s358_s16 }
 0x328   :  { %388 = shalt.err (!%p385_p4)
}
 0x329   :  { %304 = dma.vmem_to_hbm [thread:$0]  %s302_s14, 16, %s486_s5, [#allocation4]   ;;  %v293_v9 = vadd.f32 %v292_v8, %v466_v21 }
 0x32b   :  { %294 = vst.msk [vmem:[#allocation2] sm:$0x1] %vm26_vm1, %v293_v9 }
 0x32c   :  { %397 = dma.done.wait [#allocation4], 16  }
 0x32d   :  { %398 = vsyncadd [#allocation4], 4294967280 }
 0x32e   :  { %308 = vsyncpa [#allocation4], 1 }

</bundles_post_ra>
